<compile_context>
chip_gen: v7x
topology: tpu7x:2x2x1
jax: 0.10.0
libtpu: 0.0.40
codegen_flags: <defaults>
</compile_context>

<pallas_src>
import jax
import jax.numpy as jnp
from jax.experimental import pallas as pl
from jax.experimental.pallas import tpu as pltpu

SYN_TAU = 6.0
SYN_U = 0.5
SYN_TAU_Y = 1.8
SYN_BETTA = 0.4375
SYN_U0 = 0.3


def _stpnet_kernel(x_ref, w1_ref, b1_ref, w2_ref, b2_ref,
                   out_ref, hid_ref, prod_ref):
    # x_ref:   [TB, T, D]  batch-first block
    # w1_ref:  [D, H],  b1_ref: [1, H]
    # w2_ref:  [1, H]   (second linear as a row), b2_ref: [1, 1]
    # out_ref: [TB, T]  lane-dense scalar output (wrapper adds the trailing 1)
    # hid_ref: [TB*T, H]
    # prod_ref: [TB, T, D] f32 scratch holding input_syn * inputs
    TB, T, D = x_ref.shape
    H = w1_ref.shape[1]

    inv_tau = jnp.float32(1.0 / SYN_TAU)
    inv_tau_y = jnp.float32(1.0 / SYN_TAU_Y)
    betta = jnp.float32(SYN_BETTA)
    u0 = jnp.float32(SYN_U0)
    du = jnp.float32(SYN_U - SYN_U0)

    sx = jnp.ones((TB, D), jnp.float32)
    sy = jnp.ones((TB, D), jnp.float32)
    x_t = x_ref[:, 0, :].astype(jnp.float32)
    prod_ref[:, 0, :] = x_t            # syn_x_0 == 1  ->  prod_0 = x_0

    # Fully unrolled short recurrence (T is small & static): static ref indices,
    # sigmoid exps on the EUP, state FMAs on the VPU, and full cross-iteration
    # visibility for the scheduler (equivalent to fori_loop(..., unroll=True)).
    for t in range(T - 1):
        x_next = x_ref[:, t + 1, :].astype(jnp.float32)
        heaviside = 1.0 / (1.0 + jnp.exp(-20.0 * (sx - 0.5)))
        u_prob = u0 + du / (1.0 + jnp.exp(-50.0 * (sy - 0.673)))
        sy = sy - sy * inv_tau_y + betta * heaviside
        sx = sx + (1.0 - sx) * inv_tau - u_prob * sx * x_t
        sx = jnp.clip(sx, 0.0, 1.0)
        prod_ref[:, t + 1, :] = sx * x_next   # fuse gating into the recurrence
        x_t = x_next

    # Hot path: one MXU matmul over the whole (TB*T, D) activation slab.
    # (B,T,D)->(B*T,D) is tile-compatible here (T maps to sublanes, D<=128 lanes).
    prod2 = prod_ref[...].reshape(TB * T, D)
    hidden2 = jnp.dot(prod2, w1_ref[...],
                      preferred_element_type=jnp.float32) + b1_ref[...]
    hidden2 = jnp.maximum(hidden2, 0.0)
    hid_ref[...] = hidden2.astype(hid_ref.dtype)

    # Second linear has output width 1: VPU multiply + XLU lane reduce (skip the MXU).
    out_mat = jnp.sum(hidden2.reshape(TB, T, H) * w2_ref[...], axis=-1) + b2_ref[...]
    out_ref[...] = out_mat.astype(out_ref.dtype)


def stpnet_forward(x, w1, b1, w2, b2):
    """x: [B, T, D] f32. Returns (output [B,T,1], hidden [B,T,H], inputs [B,T,D])."""
    B, T, D = x.shape
    H = w1.shape[1]

    # Batch tile: full batch when small; sublane-aligned 8-row blocks when it divides.
    tb = 8 if (B > 8 and B % 8 == 0) else B
    grid = (B // tb,)

    b1_2d = b1.reshape(1, H)
    w2_row = w2.reshape(1, H)      # stored [in, out] = [H, 1] -> row [1, H]
    b2_2d = b2.reshape(1, 1)

    cost = pl.CostEstimate(
        flops=2 * B * T * D * H + 2 * B * T * H + 12 * B * T * D,
        transcendentals=2 * B * (T - 1) * D,
        bytes_accessed=4 * (B * T * D + D * H + 2 * H + 1 + B * T * H + B * T),
    )

    out2d, hid2d = pl.pallas_call(
        _stpnet_kernel,
        out_shape=(jax.ShapeDtypeStruct((B, T), jnp.float32),
                   jax.ShapeDtypeStruct((B * T, H), jnp.float32)),
        grid_spec=pltpu.PrefetchScalarGridSpec(
            num_scalar_prefetch=0,
            grid=grid,
            in_specs=[
                pl.BlockSpec((tb, T, D), lambda i: (i, 0, 0)),
                pl.BlockSpec((D, H), lambda i: (0, 0)),
                pl.BlockSpec((1, H), lambda i: (0, 0)),
                pl.BlockSpec((1, H), lambda i: (0, 0)),
                pl.BlockSpec((1, 1), lambda i: (0, 0)),
            ],
            out_specs=[
                pl.BlockSpec((tb, T), lambda i: (i, 0)),
                pl.BlockSpec((tb * T, H), lambda i: (i, 0)),
            ],
            scratch_shapes=[pltpu.VMEM((tb, T, D), jnp.float32)],
        ),
        compiler_params=pltpu.CompilerParams(
            dimension_semantics=("parallel",),
            vmem_limit_bytes=32 * 1024 * 1024),
        cost_estimate=cost,
    )(x, w1, b1_2d, w2_row, b2_2d)

    output = out2d.reshape(B, T, 1)    # free contiguous reshape (no transpose)
    hidden = hid2d.reshape(B, T, H)    # free contiguous reshape (no transpose)
    return output, hidden, x


def stpnet_reference(x, w1, b1, w2, b2):
    """Pure-JAX reference mirroring the PyTorch STPNetWithSpikes forward (noise off)."""
    B, T, D = x.shape
    inv_tau = jnp.float32(1.0 / SYN_TAU)
    inv_tau_y = jnp.float32(1.0 / SYN_TAU_Y)
    betta = jnp.float32(SYN_BETTA)
    u0 = jnp.float32(SYN_U0)
    du = jnp.float32(SYN_U - SYN_U0)

    sx = jnp.ones((B, D), jnp.float32)
    sy = jnp.ones((B, D), jnp.float32)
    syn_list = [sx]
    for i in range(T - 1):
        heaviside = 1.0 / (1.0 + jnp.exp(-20.0 * (sx - 0.5)))
        u_prob = u0 + du / (1.0 + jnp.exp(-50.0 * (sy - 0.673)))
        sy = sy - sy * inv_tau_y + betta * heaviside
        sx = sx + (1.0 - sx) * inv_tau - u_prob * sx * x[:, i]
        sx = jnp.clip(sx, 0.0, 1.0)
        syn_list.append(sx)
    input_syn = jnp.stack(syn_list, axis=1)                       # [B, T, D]
    hidden = jax.nn.relu(
        jnp.einsum('btd,dh->bth', input_syn * x, w1,
                   precision=jax.lax.Precision.HIGHEST) + b1)
    output = jnp.einsum('bth,ho->bto', hidden, w2,
                        precision=jax.lax.Precision.HIGHEST) + b2
    return output, hidden, x


if __name__ == "__main__":
    batch, seq, input_dim, hidden_dim = 2, 8, 64, 16

    key = jax.random.PRNGKey(0)
    kx, kw1, kb1, kw2, kb2 = jax.random.split(key, 5)

    # Deterministic synthetic parameters (PyTorch Linear weight [out,in] stored as [in,out]).
    x = jax.random.uniform(kx, (batch, seq, input_dim), jnp.float32)   # spike-rate-like inputs
    w1 = jax.random.normal(kw1, (input_dim, hidden_dim), jnp.float32) * 0.1
    b1 = jax.random.normal(kb1, (hidden_dim,), jnp.float32) * 0.1
    w2 = jax.random.normal(kw2, (hidden_dim, 1), jnp.float32) * 0.1
    b2 = jax.random.normal(kb2, (1,), jnp.float32) * 0.1

    out, hid, inp = stpnet_forward(x, w1, b1, w2, b2)
    jax.block_until_ready((out, hid, inp))

    ref_out, ref_hid, ref_inp = stpnet_reference(x, w1, b1, w2, b2)
    assert out.shape == (batch, seq, 1)
    assert hid.shape == (batch, seq, hidden_dim)
    assert inp.shape == (batch, seq, input_dim)
    assert jnp.allclose(out, ref_out, atol=1e-5, rtol=1e-5)
    assert jnp.allclose(hid, ref_hid, atol=1e-5, rtol=1e-5)
    assert jnp.allclose(inp, ref_inp)

    print("KERNEL_OK")
</pallas_src>

<mosaic_0001>
module attributes {stable_mosaic.version = 11 : i64} {
  func.func @_stpnet_kernel(%arg0: i32, %arg1: memref<2x8x64xf32, #tpu.memory_space<vmem>>, %arg2: memref<64x16xf32, #tpu.memory_space<vmem>>, %arg3: memref<1x16xf32, #tpu.memory_space<vmem>>, %arg4: memref<1x16xf32, #tpu.memory_space<vmem>>, %arg5: memref<1x1xf32, #tpu.memory_space<vmem>>, %arg6: memref<2x8xf32, #tpu.memory_space<vmem>>, %arg7: memref<16x16xf32, #tpu.memory_space<vmem>>, %arg8: memref<2x8x64xf32, #tpu.memory_space<vmem>>) attributes {dimension_semantics = [#tpu.dimension_semantics<parallel>], iteration_bounds = array<i64: 1>, scalar_prefetch = 0 : i64, scratch_operands = 1 : i64, tpu.core_type = #tpu.core_type<tc>, window_params = [{transform_indices = @transform_0, window_bounds = array<i64: 2, 8, 64>}, {pipeline_mode = #tpu.pipeline_mode<synchronous>, transform_indices = @transform_1, window_bounds = array<i64: 64, 16>}, {pipeline_mode = #tpu.pipeline_mode<synchronous>, transform_indices = @transform_2, window_bounds = array<i64: 1, 16>}, {pipeline_mode = #tpu.pipeline_mode<synchronous>, transform_indices = @transform_3, window_bounds = array<i64: 1, 16>}, {pipeline_mode = #tpu.pipeline_mode<synchronous>, transform_indices = @transform_4, window_bounds = array<i64: 1, 1>}, {transform_indices = @transform_5, window_bounds = array<i64: 2, 8>}, {transform_indices = @transform_6, window_bounds = array<i64: 16, 16>}]} {
    %cst = arith.constant 1.000000e+00 : f32
    %0 = vector.broadcast %cst : f32 to vector<2x64xf32>
    %cst_0 = arith.constant 1.000000e+00 : f32
    %1 = vector.broadcast %cst_0 : f32 to vector<2x64xf32>
    %c0 = arith.constant 0 : index
    %c0_1 = arith.constant 0 : index
    %c0_2 = arith.constant 0 : index
    %2 = vector.load %arg1[%c0, %c0_1, %c0_2] : memref<2x8x64xf32, #tpu.memory_space<vmem>>, vector<2x1x64xf32>
    %3 = vector.shape_cast %2 : vector<2x1x64xf32> to vector<2x64xf32>
    %c0_3 = arith.constant 0 : index
    %c0_4 = arith.constant 0 : index
    %c0_5 = arith.constant 0 : index
    %4 = vector.load %arg8[%c0_3, %c0_4, %c0_5] : memref<2x8x64xf32, #tpu.memory_space<vmem>>, vector<2x1x64xf32>
    %5 = vector.shape_cast %4 : vector<2x1x64xf32> to vector<2x64xf32>
    %6 = vector.shape_cast %3 : vector<2x64xf32> to vector<2x1x64xf32>
    tpu.vector_store %arg8[%c0_3, %c0_4, %c0_5], %6 {strides = array<i32>} : memref<2x8x64xf32, #tpu.memory_space<vmem>>, vector<2x1x64xf32>,
    %c0_6 = arith.constant 0 : index
    %c1 = arith.constant 1 : index
    %c0_7 = arith.constant 0 : index
    %7 = vector.load %arg1[%c0_6, %c1, %c0_7] : memref<2x8x64xf32, #tpu.memory_space<vmem>>, vector<2x1x64xf32>
    %8 = vector.shape_cast %7 : vector<2x1x64xf32> to vector<2x64xf32>
    %cst_8 = arith.constant 5.000000e-01 : f32
    %9 = vector.broadcast %cst_8 : f32 to vector<2x64xf32>
    %10 = arith.subf %0, %9 : vector<2x64xf32>
    %cst_9 = arith.constant -2.000000e+01 : f32
    %11 = vector.broadcast %cst_9 : f32 to vector<2x64xf32>
    %12 = arith.mulf %11, %10 : vector<2x64xf32>
    %13 = math.exp %12 : vector<2x64xf32>
    %cst_10 = arith.constant 1.000000e+00 : f32
    %14 = vector.broadcast %cst_10 : f32 to vector<2x64xf32>
    %15 = arith.addf %14, %13 : vector<2x64xf32>
    %cst_11 = arith.constant 1.000000e+00 : f32
    %16 = vector.broadcast %cst_11 : f32 to vector<2x64xf32>
    %17 = arith.divf %16, %15 : vector<2x64xf32>
    %cst_12 = arith.constant 6.730000e-01 : f32
    %18 = vector.broadcast %cst_12 : f32 to vector<2x64xf32>
    %19 = arith.subf %1, %18 : vector<2x64xf32>
    %cst_13 = arith.constant -5.000000e+01 : f32
    %20 = vector.broadcast %cst_13 : f32 to vector<2x64xf32>
    %21 = arith.mulf %20, %19 : vector<2x64xf32>
    %22 = math.exp %21 : vector<2x64xf32>
    %cst_14 = arith.constant 1.000000e+00 : f32
    %23 = vector.broadcast %cst_14 : f32 to vector<2x64xf32>
    %24 = arith.addf %23, %22 : vector<2x64xf32>
    %cst_15 = arith.constant 2.000000e-01 : f32
    %25 = vector.broadcast %cst_15 : f32 to vector<2x64xf32>
    %26 = arith.divf %25, %24 : vector<2x64xf32>
    %cst_16 = arith.constant 3.000000e-01 : f32
    %27 = vector.broadcast %cst_16 : f32 to vector<2x64xf32>
    %28 = arith.addf %27, %26 : vector<2x64xf32>
    %cst_17 = arith.constant 0.555555582 : f32
    %29 = vector.broadcast %cst_17 : f32 to vector<2x64xf32>
    %30 = arith.mulf %1, %29 : vector<2x64xf32>
    %31 = arith.subf %1, %30 : vector<2x64xf32>
    %cst_18 = arith.constant 4.375000e-01 : f32
    %32 = vector.broadcast %cst_18 : f32 to vector<2x64xf32>
    %33 = arith.mulf %32, %17 : vector<2x64xf32>
    %34 = arith.addf %31, %33 : vector<2x64xf32>
    %cst_19 = arith.constant 1.000000e+00 : f32
    %35 = vector.broadcast %cst_19 : f32 to vector<2x64xf32>
    %36 = arith.subf %35, %0 : vector<2x64xf32>
    %cst_20 = arith.constant 0.166666672 : f32
    %37 = vector.broadcast %cst_20 : f32 to vector<2x64xf32>
    %38 = arith.mulf %36, %37 : vector<2x64xf32>
    %39 = arith.addf %0, %38 : vector<2x64xf32>
    %40 = arith.mulf %28, %0 : vector<2x64xf32>
    %41 = arith.mulf %40, %3 : vector<2x64xf32>
    %42 = arith.subf %39, %41 : vector<2x64xf32>
    %cst_21 = arith.constant 0.000000e+00 : f32
    %cst_22 = arith.constant 1.000000e+00 : f32
    %43 = vector.broadcast %cst_21 : f32 to vector<2x64xf32>
    %44 = arith.maximumf %43, %42 : vector<2x64xf32>
    %45 = vector.broadcast %cst_22 : f32 to vector<2x64xf32>
    %46 = arith.minimumf %45, %44 : vector<2x64xf32>
    %47 = arith.mulf %46, %8 : vector<2x64xf32>
    %c0_23 = arith.constant 0 : index
    %c1_24 = arith.constant 1 : index
    %c0_25 = arith.constant 0 : index
    %48 = vector.load %arg8[%c0_23, %c1_24, %c0_25] : memref<2x8x64xf32, #tpu.memory_space<vmem>>, vector<2x1x64xf32>
    %49 = vector.shape_cast %48 : vector<2x1x64xf32> to vector<2x64xf32>
    %50 = vector.shape_cast %47 : vector<2x64xf32> to vector<2x1x64xf32>
    tpu.vector_store %arg8[%c0_23, %c1_24, %c0_25], %50 {strides = array<i32>} : memref<2x8x64xf32, #tpu.memory_space<vmem>>, vector<2x1x64xf32>,
    %c0_26 = arith.constant 0 : index
    %c2 = arith.constant 2 : index
    %c0_27 = arith.constant 0 : index
    %51 = vector.load %arg1[%c0_26, %c2, %c0_27] : memref<2x8x64xf32, #tpu.memory_space<vmem>>, vector<2x1x64xf32>
    %52 = vector.shape_cast %51 : vector<2x1x64xf32> to vector<2x64xf32>
    %cst_28 = arith.constant 5.000000e-01 : f32
    %53 = vector.broadcast %cst_28 : f32 to vector<2x64xf32>
    %54 = arith.subf %46, %53 : vector<2x64xf32>
    %cst_29 = arith.constant -2.000000e+01 : f32
    %55 = vector.broadcast %cst_29 : f32 to vector<2x64xf32>
    %56 = arith.mulf %55, %54 : vector<2x64xf32>
    %57 = math.exp %56 : vector<2x64xf32>
    %cst_30 = arith.constant 1.000000e+00 : f32
    %58 = vector.broadcast %cst_30 : f32 to vector<2x64xf32>
    %59 = arith.addf %58, %57 : vector<2x64xf32>
    %cst_31 = arith.constant 1.000000e+00 : f32
    %60 = vector.broadcast %cst_31 : f32 to vector<2x64xf32>
    %61 = arith.divf %60, %59 : vector<2x64xf32>
    %cst_32 = arith.constant 6.730000e-01 : f32
    %62 = vector.broadcast %cst_32 : f32 to vector<2x64xf32>
    %63 = arith.subf %34, %62 : vector<2x64xf32>
    %cst_33 = arith.constant -5.000000e+01 : f32
    %64 = vector.broadcast %cst_33 : f32 to vector<2x64xf32>
    %65 = arith.mulf %64, %63 : vector<2x64xf32>
    %66 = math.exp %65 : vector<2x64xf32>
    %cst_34 = arith.constant 1.000000e+00 : f32
    %67 = vector.broadcast %cst_34 : f32 to vector<2x64xf32>
    %68 = arith.addf %67, %66 : vector<2x64xf32>
    %cst_35 = arith.constant 2.000000e-01 : f32
    %69 = vector.broadcast %cst_35 : f32 to vector<2x64xf32>
    %70 = arith.divf %69, %68 : vector<2x64xf32>
    %cst_36 = arith.constant 3.000000e-01 : f32
    %71 = vector.broadcast %cst_36 : f32 to vector<2x64xf32>
    %72 = arith.addf %71, %70 : vector<2x64xf32>
    %cst_37 = arith.constant 0.555555582 : f32
    %73 = vector.broadcast %cst_37 : f32 to vector<2x64xf32>
    %74 = arith.mulf %34, %73 : vector<2x64xf32>
    %75 = arith.subf %34, %74 : vector<2x64xf32>
    %cst_38 = arith.constant 4.375000e-01 : f32
    %76 = vector.broadcast %cst_38 : f32 to vector<2x64xf32>
    %77 = arith.mulf %76, %61 : vector<2x64xf32>
    %78 = arith.addf %75, %77 : vector<2x64xf32>
    %cst_39 = arith.constant 1.000000e+00 : f32
    %79 = vector.broadcast %cst_39 : f32 to vector<2x64xf32>
    %80 = arith.subf %79, %46 : vector<2x64xf32>
    %cst_40 = arith.constant 0.166666672 : f32
    %81 = vector.broadcast %cst_40 : f32 to vector<2x64xf32>
    %82 = arith.mulf %80, %81 : vector<2x64xf32>
    %83 = arith.addf %46, %82 : vector<2x64xf32>
    %84 = arith.mulf %72, %46 : vector<2x64xf32>
    %85 = arith.mulf %84, %8 : vector<2x64xf32>
    %86 = arith.subf %83, %85 : vector<2x64xf32>
    %cst_41 = arith.constant 0.000000e+00 : f32
    %cst_42 = arith.constant 1.000000e+00 : f32
    %87 = vector.broadcast %cst_41 : f32 to vector<2x64xf32>
    %88 = arith.maximumf %87, %86 : vector<2x64xf32>
    %89 = vector.broadcast %cst_42 : f32 to vector<2x64xf32>
    %90 = arith.minimumf %89, %88 : vector<2x64xf32>
    %91 = arith.mulf %90, %52 : vector<2x64xf32>
    %c0_43 = arith.constant 0 : index
    %c2_44 = arith.constant 2 : index
    %c0_45 = arith.constant 0 : index
    %92 = vector.load %arg8[%c0_43, %c2_44, %c0_45] : memref<2x8x64xf32, #tpu.memory_space<vmem>>, vector<2x1x64xf32>
    %93 = vector.shape_cast %92 : vector<2x1x64xf32> to vector<2x64xf32>
    %94 = vector.shape_cast %91 : vector<2x64xf32> to vector<2x1x64xf32>
    tpu.vector_store %arg8[%c0_43, %c2_44, %c0_45], %94 {strides = array<i32>} : memref<2x8x64xf32, #tpu.memory_space<vmem>>, vector<2x1x64xf32>,
    %c0_46 = arith.constant 0 : index
    %c3 = arith.constant 3 : index
    %c0_47 = arith.constant 0 : index
    %95 = vector.load %arg1[%c0_46, %c3, %c0_47] : memref<2x8x64xf32, #tpu.memory_space<vmem>>, vector<2x1x64xf32>
    %96 = vector.shape_cast %95 : vector<2x1x64xf32> to vector<2x64xf32>
    %cst_48 = arith.constant 5.000000e-01 : f32
    %97 = vector.broadcast %cst_48 : f32 to vector<2x64xf32>
    %98 = arith.subf %90, %97 : vector<2x64xf32>
    %cst_49 = arith.constant -2.000000e+01 : f32
    %99 = vector.broadcast %cst_49 : f32 to vector<2x64xf32>
    %100 = arith.mulf %99, %98 : vector<2x64xf32>
    %101 = math.exp %100 : vector<2x64xf32>
    %cst_50 = arith.constant 1.000000e+00 : f32
    %102 = vector.broadcast %cst_50 : f32 to vector<2x64xf32>
    %103 = arith.addf %102, %101 : vector<2x64xf32>
    %cst_51 = arith.constant 1.000000e+00 : f32
    %104 = vector.broadcast %cst_51 : f32 to vector<2x64xf32>
    %105 = arith.divf %104, %103 : vector<2x64xf32>
    %cst_52 = arith.constant 6.730000e-01 : f32
    %106 = vector.broadcast %cst_52 : f32 to vector<2x64xf32>
    %107 = arith.subf %78, %106 : vector<2x64xf32>
    %cst_53 = arith.constant -5.000000e+01 : f32
    %108 = vector.broadcast %cst_53 : f32 to vector<2x64xf32>
    %109 = arith.mulf %108, %107 : vector<2x64xf32>
    %110 = math.exp %109 : vector<2x64xf32>
    %cst_54 = arith.constant 1.000000e+00 : f32
    %111 = vector.broadcast %cst_54 : f32 to vector<2x64xf32>
    %112 = arith.addf %111, %110 : vector<2x64xf32>
    %cst_55 = arith.constant 2.000000e-01 : f32
    %113 = vector.broadcast %cst_55 : f32 to vector<2x64xf32>
    %114 = arith.divf %113, %112 : vector<2x64xf32>
    %cst_56 = arith.constant 3.000000e-01 : f32
    %115 = vector.broadcast %cst_56 : f32 to vector<2x64xf32>
    %116 = arith.addf %115, %114 : vector<2x64xf32>
    %cst_57 = arith.constant 0.555555582 : f32
    %117 = vector.broadcast %cst_57 : f32 to vector<2x64xf32>
    %118 = arith.mulf %78, %117 : vector<2x64xf32>
    %119 = arith.subf %78, %118 : vector<2x64xf32>
    %cst_58 = arith.constant 4.375000e-01 : f32
    %120 = vector.broadcast %cst_58 : f32 to vector<2x64xf32>
    %121 = arith.mulf %120, %105 : vector<2x64xf32>
    %122 = arith.addf %119, %121 : vector<2x64xf32>
    %cst_59 = arith.constant 1.000000e+00 : f32
    %123 = vector.broadcast %cst_59 : f32 to vector<2x64xf32>
    %124 = arith.subf %123, %90 : vector<2x64xf32>
    %cst_60 = arith.constant 0.166666672 : f32
    %125 = vector.broadcast %cst_60 : f32 to vector<2x64xf32>
    %126 = arith.mulf %124, %125 : vector<2x64xf32>
    %127 = arith.addf %90, %126 : vector<2x64xf32>
    %128 = arith.mulf %116, %90 : vector<2x64xf32>
    %129 = arith.mulf %128, %52 : vector<2x64xf32>
    %130 = arith.subf %127, %129 : vector<2x64xf32>
    %cst_61 = arith.constant 0.000000e+00 : f32
    %cst_62 = arith.constant 1.000000e+00 : f32
    %131 = vector.broadcast %cst_61 : f32 to vector<2x64xf32>
    %132 = arith.maximumf %131, %130 : vector<2x64xf32>
    %133 = vector.broadcast %cst_62 : f32 to vector<2x64xf32>
    %134 = arith.minimumf %133, %132 : vector<2x64xf32>
    %135 = arith.mulf %134, %96 : vector<2x64xf32>
    %c0_63 = arith.constant 0 : index
    %c3_64 = arith.constant 3 : index
    %c0_65 = arith.constant 0 : index
    %136 = vector.load %arg8[%c0_63, %c3_64, %c0_65] : memref<2x8x64xf32, #tpu.memory_space<vmem>>, vector<2x1x64xf32>
    %137 = vector.shape_cast %136 : vector<2x1x64xf32> to vector<2x64xf32>
    %138 = vector.shape_cast %135 : vector<2x64xf32> to vector<2x1x64xf32>
    tpu.vector_store %arg8[%c0_63, %c3_64, %c0_65], %138 {strides = array<i32>} : memref<2x8x64xf32, #tpu.memory_space<vmem>>, vector<2x1x64xf32>,
    %c0_66 = arith.constant 0 : index
    %c4 = arith.constant 4 : index
    %c0_67 = arith.constant 0 : index
    %139 = vector.load %arg1[%c0_66, %c4, %c0_67] : memref<2x8x64xf32, #tpu.memory_space<vmem>>, vector<2x1x64xf32>
    %140 = vector.shape_cast %139 : vector<2x1x64xf32> to vector<2x64xf32>
    %cst_68 = arith.constant 5.000000e-01 : f32
    %141 = vector.broadcast %cst_68 : f32 to vector<2x64xf32>
    %142 = arith.subf %134, %141 : vector<2x64xf32>
    %cst_69 = arith.constant -2.000000e+01 : f32
    %143 = vector.broadcast %cst_69 : f32 to vector<2x64xf32>
    %144 = arith.mulf %143, %142 : vector<2x64xf32>
    %145 = math.exp %144 : vector<2x64xf32>
    %cst_70 = arith.constant 1.000000e+00 : f32
    %146 = vector.broadcast %cst_70 : f32 to vector<2x64xf32>
    %147 = arith.addf %146, %145 : vector<2x64xf32>
    %cst_71 = arith.constant 1.000000e+00 : f32
    %148 = vector.broadcast %cst_71 : f32 to vector<2x64xf32>
    %149 = arith.divf %148, %147 : vector<2x64xf32>
    %cst_72 = arith.constant 6.730000e-01 : f32
    %150 = vector.broadcast %cst_72 : f32 to vector<2x64xf32>
    %151 = arith.subf %122, %150 : vector<2x64xf32>
    %cst_73 = arith.constant -5.000000e+01 : f32
    %152 = vector.broadcast %cst_73 : f32 to vector<2x64xf32>
    %153 = arith.mulf %152, %151 : vector<2x64xf32>
    %154 = math.exp %153 : vector<2x64xf32>
    %cst_74 = arith.constant 1.000000e+00 : f32
    %155 = vector.broadcast %cst_74 : f32 to vector<2x64xf32>
    %156 = arith.addf %155, %154 : vector<2x64xf32>
    %cst_75 = arith.constant 2.000000e-01 : f32
    %157 = vector.broadcast %cst_75 : f32 to vector<2x64xf32>
    %158 = arith.divf %157, %156 : vector<2x64xf32>
    %cst_76 = arith.constant 3.000000e-01 : f32
    %159 = vector.broadcast %cst_76 : f32 to vector<2x64xf32>
    %160 = arith.addf %159, %158 : vector<2x64xf32>
    %cst_77 = arith.constant 0.555555582 : f32
    %161 = vector.broadcast %cst_77 : f32 to vector<2x64xf32>
    %162 = arith.mulf %122, %161 : vector<2x64xf32>
    %163 = arith.subf %122, %162 : vector<2x64xf32>
    %cst_78 = arith.constant 4.375000e-01 : f32
    %164 = vector.broadcast %cst_78 : f32 to vector<2x64xf32>
    %165 = arith.mulf %164, %149 : vector<2x64xf32>
    %166 = arith.addf %163, %165 : vector<2x64xf32>
    %cst_79 = arith.constant 1.000000e+00 : f32
    %167 = vector.broadcast %cst_79 : f32 to vector<2x64xf32>
    %168 = arith.subf %167, %134 : vector<2x64xf32>
    %cst_80 = arith.constant 0.166666672 : f32
    %169 = vector.broadcast %cst_80 : f32 to vector<2x64xf32>
    %170 = arith.mulf %168, %169 : vector<2x64xf32>
    %171 = arith.addf %134, %170 : vector<2x64xf32>
    %172 = arith.mulf %160, %134 : vector<2x64xf32>
    %173 = arith.mulf %172, %96 : vector<2x64xf32>
    %174 = arith.subf %171, %173 : vector<2x64xf32>
    %cst_81 = arith.constant 0.000000e+00 : f32
    %cst_82 = arith.constant 1.000000e+00 : f32
    %175 = vector.broadcast %cst_81 : f32 to vector<2x64xf32>
    %176 = arith.maximumf %175, %174 : vector<2x64xf32>
    %177 = vector.broadcast %cst_82 : f32 to vector<2x64xf32>
    %178 = arith.minimumf %177, %176 : vector<2x64xf32>
    %179 = arith.mulf %178, %140 : vector<2x64xf32>
    %c0_83 = arith.constant 0 : index
    %c4_84 = arith.constant 4 : index
    %c0_85 = arith.constant 0 : index
    %180 = vector.load %arg8[%c0_83, %c4_84, %c0_85] : memref<2x8x64xf32, #tpu.memory_space<vmem>>, vector<2x1x64xf32>
    %181 = vector.shape_cast %180 : vector<2x1x64xf32> to vector<2x64xf32>
    %182 = vector.shape_cast %179 : vector<2x64xf32> to vector<2x1x64xf32>
    tpu.vector_store %arg8[%c0_83, %c4_84, %c0_85], %182 {strides = array<i32>} : memref<2x8x64xf32, #tpu.memory_space<vmem>>, vector<2x1x64xf32>,
    %c0_86 = arith.constant 0 : index
    %c5 = arith.constant 5 : index
    %c0_87 = arith.constant 0 : index
    %183 = vector.load %arg1[%c0_86, %c5, %c0_87] : memref<2x8x64xf32, #tpu.memory_space<vmem>>, vector<2x1x64xf32>
    %184 = vector.shape_cast %183 : vector<2x1x64xf32> to vector<2x64xf32>
    %cst_88 = arith.constant 5.000000e-01 : f32
    %185 = vector.broadcast %cst_88 : f32 to vector<2x64xf32>
    %186 = arith.subf %178, %185 : vector<2x64xf32>
    %cst_89 = arith.constant -2.000000e+01 : f32
    %187 = vector.broadcast %cst_89 : f32 to vector<2x64xf32>
    %188 = arith.mulf %187, %186 : vector<2x64xf32>
    %189 = math.exp %188 : vector<2x64xf32>
    %cst_90 = arith.constant 1.000000e+00 : f32
    %190 = vector.broadcast %cst_90 : f32 to vector<2x64xf32>
    %191 = arith.addf %190, %189 : vector<2x64xf32>
    %cst_91 = arith.constant 1.000000e+00 : f32
    %192 = vector.broadcast %cst_91 : f32 to vector<2x64xf32>
    %193 = arith.divf %192, %191 : vector<2x64xf32>
    %cst_92 = arith.constant 6.730000e-01 : f32
    %194 = vector.broadcast %cst_92 : f32 to vector<2x64xf32>
    %195 = arith.subf %166, %194 : vector<2x64xf32>
    %cst_93 = arith.constant -5.000000e+01 : f32
    %196 = vector.broadcast %cst_93 : f32 to vector<2x64xf32>
    %197 = arith.mulf %196, %195 : vector<2x64xf32>
    %198 = math.exp %197 : vector<2x64xf32>
    %cst_94 = arith.constant 1.000000e+00 : f32
    %199 = vector.broadcast %cst_94 : f32 to vector<2x64xf32>
    %200 = arith.addf %199, %198 : vector<2x64xf32>
    %cst_95 = arith.constant 2.000000e-01 : f32
    %201 = vector.broadcast %cst_95 : f32 to vector<2x64xf32>
    %202 = arith.divf %201, %200 : vector<2x64xf32>
    %cst_96 = arith.constant 3.000000e-01 : f32
    %203 = vector.broadcast %cst_96 : f32 to vector<2x64xf32>
    %204 = arith.addf %203, %202 : vector<2x64xf32>
    %cst_97 = arith.constant 0.555555582 : f32
    %205 = vector.broadcast %cst_97 : f32 to vector<2x64xf32>
    %206 = arith.mulf %166, %205 : vector<2x64xf32>
    %207 = arith.subf %166, %206 : vector<2x64xf32>
    %cst_98 = arith.constant 4.375000e-01 : f32
    %208 = vector.broadcast %cst_98 : f32 to vector<2x64xf32>
    %209 = arith.mulf %208, %193 : vector<2x64xf32>
    %210 = arith.addf %207, %209 : vector<2x64xf32>
    %cst_99 = arith.constant 1.000000e+00 : f32
    %211 = vector.broadcast %cst_99 : f32 to vector<2x64xf32>
    %212 = arith.subf %211, %178 : vector<2x64xf32>
    %cst_100 = arith.constant 0.166666672 : f32
    %213 = vector.broadcast %cst_100 : f32 to vector<2x64xf32>
    %214 = arith.mulf %212, %213 : vector<2x64xf32>
    %215 = arith.addf %178, %214 : vector<2x64xf32>
    %216 = arith.mulf %204, %178 : vector<2x64xf32>
    %217 = arith.mulf %216, %140 : vector<2x64xf32>
    %218 = arith.subf %215, %217 : vector<2x64xf32>
    %cst_101 = arith.constant 0.000000e+00 : f32
    %cst_102 = arith.constant 1.000000e+00 : f32
    %219 = vector.broadcast %cst_101 : f32 to vector<2x64xf32>
    %220 = arith.maximumf %219, %218 : vector<2x64xf32>
    %221 = vector.broadcast %cst_102 : f32 to vector<2x64xf32>
    %222 = arith.minimumf %221, %220 : vector<2x64xf32>
    %223 = arith.mulf %222, %184 : vector<2x64xf32>
    %c0_103 = arith.constant 0 : index
    %c5_104 = arith.constant 5 : index
    %c0_105 = arith.constant 0 : index
    %224 = vector.load %arg8[%c0_103, %c5_104, %c0_105] : memref<2x8x64xf32, #tpu.memory_space<vmem>>, vector<2x1x64xf32>
    %225 = vector.shape_cast %224 : vector<2x1x64xf32> to vector<2x64xf32>
    %226 = vector.shape_cast %223 : vector<2x64xf32> to vector<2x1x64xf32>
    tpu.vector_store %arg8[%c0_103, %c5_104, %c0_105], %226 {strides = array<i32>} : memref<2x8x64xf32, #tpu.memory_space<vmem>>, vector<2x1x64xf32>,
    %c0_106 = arith.constant 0 : index
    %c6 = arith.constant 6 : index
    %c0_107 = arith.constant 0 : index
    %227 = vector.load %arg1[%c0_106, %c6, %c0_107] : memref<2x8x64xf32, #tpu.memory_space<vmem>>, vector<2x1x64xf32>
    %228 = vector.shape_cast %227 : vector<2x1x64xf32> to vector<2x64xf32>
    %cst_108 = arith.constant 5.000000e-01 : f32
    %229 = vector.broadcast %cst_108 : f32 to vector<2x64xf32>
    %230 = arith.subf %222, %229 : vector<2x64xf32>
    %cst_109 = arith.constant -2.000000e+01 : f32
    %231 = vector.broadcast %cst_109 : f32 to vector<2x64xf32>
    %232 = arith.mulf %231, %230 : vector<2x64xf32>
    %233 = math.exp %232 : vector<2x64xf32>
    %cst_110 = arith.constant 1.000000e+00 : f32
    %234 = vector.broadcast %cst_110 : f32 to vector<2x64xf32>
    %235 = arith.addf %234, %233 : vector<2x64xf32>
    %cst_111 = arith.constant 1.000000e+00 : f32
    %236 = vector.broadcast %cst_111 : f32 to vector<2x64xf32>
    %237 = arith.divf %236, %235 : vector<2x64xf32>
    %cst_112 = arith.constant 6.730000e-01 : f32
    %238 = vector.broadcast %cst_112 : f32 to vector<2x64xf32>
    %239 = arith.subf %210, %238 : vector<2x64xf32>
    %cst_113 = arith.constant -5.000000e+01 : f32
    %240 = vector.broadcast %cst_113 : f32 to vector<2x64xf32>
    %241 = arith.mulf %240, %239 : vector<2x64xf32>
    %242 = math.exp %241 : vector<2x64xf32>
    %cst_114 = arith.constant 1.000000e+00 : f32
    %243 = vector.broadcast %cst_114 : f32 to vector<2x64xf32>
    %244 = arith.addf %243, %242 : vector<2x64xf32>
    %cst_115 = arith.constant 2.000000e-01 : f32
    %245 = vector.broadcast %cst_115 : f32 to vector<2x64xf32>
    %246 = arith.divf %245, %244 : vector<2x64xf32>
    %cst_116 = arith.constant 3.000000e-01 : f32
    %247 = vector.broadcast %cst_116 : f32 to vector<2x64xf32>
    %248 = arith.addf %247, %246 : vector<2x64xf32>
    %cst_117 = arith.constant 0.555555582 : f32
    %249 = vector.broadcast %cst_117 : f32 to vector<2x64xf32>
    %250 = arith.mulf %210, %249 : vector<2x64xf32>
    %251 = arith.subf %210, %250 : vector<2x64xf32>
    %cst_118 = arith.constant 4.375000e-01 : f32
    %252 = vector.broadcast %cst_118 : f32 to vector<2x64xf32>
    %253 = arith.mulf %252, %237 : vector<2x64xf32>
    %254 = arith.addf %251, %253 : vector<2x64xf32>
    %cst_119 = arith.constant 1.000000e+00 : f32
    %255 = vector.broadcast %cst_119 : f32 to vector<2x64xf32>
    %256 = arith.subf %255, %222 : vector<2x64xf32>
    %cst_120 = arith.constant 0.166666672 : f32
    %257 = vector.broadcast %cst_120 : f32 to vector<2x64xf32>
    %258 = arith.mulf %256, %257 : vector<2x64xf32>
    %259 = arith.addf %222, %258 : vector<2x64xf32>
    %260 = arith.mulf %248, %222 : vector<2x64xf32>
    %261 = arith.mulf %260, %184 : vector<2x64xf32>
    %262 = arith.subf %259, %261 : vector<2x64xf32>
    %cst_121 = arith.constant 0.000000e+00 : f32
    %cst_122 = arith.constant 1.000000e+00 : f32
    %263 = vector.broadcast %cst_121 : f32 to vector<2x64xf32>
    %264 = arith.maximumf %263, %262 : vector<2x64xf32>
    %265 = vector.broadcast %cst_122 : f32 to vector<2x64xf32>
    %266 = arith.minimumf %265, %264 : vector<2x64xf32>
    %267 = arith.mulf %266, %228 : vector<2x64xf32>
    %c0_123 = arith.constant 0 : index
    %c6_124 = arith.constant 6 : index
    %c0_125 = arith.constant 0 : index
    %268 = vector.load %arg8[%c0_123, %c6_124, %c0_125] : memref<2x8x64xf32, #tpu.memory_space<vmem>>, vector<2x1x64xf32>
    %269 = vector.shape_cast %268 : vector<2x1x64xf32> to vector<2x64xf32>
    %270 = vector.shape_cast %267 : vector<2x64xf32> to vector<2x1x64xf32>
    tpu.vector_store %arg8[%c0_123, %c6_124, %c0_125], %270 {strides = array<i32>} : memref<2x8x64xf32, #tpu.memory_space<vmem>>, vector<2x1x64xf32>,
    %c0_126 = arith.constant 0 : index
    %c7 = arith.constant 7 : index
    %c0_127 = arith.constant 0 : index
    %271 = vector.load %arg1[%c0_126, %c7, %c0_127] : memref<2x8x64xf32, #tpu.memory_space<vmem>>, vector<2x1x64xf32>
    %272 = vector.shape_cast %271 : vector<2x1x64xf32> to vector<2x64xf32>
    %cst_128 = arith.constant 6.730000e-01 : f32
    %273 = vector.broadcast %cst_128 : f32 to vector<2x64xf32>
    %274 = arith.subf %254, %273 : vector<2x64xf32>
    %cst_129 = arith.constant -5.000000e+01 : f32
    %275 = vector.broadcast %cst_129 : f32 to vector<2x64xf32>
    %276 = arith.mulf %275, %274 : vector<2x64xf32>
    %277 = math.exp %276 : vector<2x64xf32>
    %cst_130 = arith.constant 1.000000e+00 : f32
    %278 = vector.broadcast %cst_130 : f32 to vector<2x64xf32>
    %279 = arith.addf %278, %277 : vector<2x64xf32>
    %cst_131 = arith.constant 2.000000e-01 : f32
    %280 = vector.broadcast %cst_131 : f32 to vector<2x64xf32>
    %281 = arith.divf %280, %279 : vector<2x64xf32>
    %cst_132 = arith.constant 3.000000e-01 : f32
    %282 = vector.broadcast %cst_132 : f32 to vector<2x64xf32>
    %283 = arith.addf %282, %281 : vector<2x64xf32>
    %cst_133 = arith.constant 1.000000e+00 : f32
    %284 = vector.broadcast %cst_133 : f32 to vector<2x64xf32>
    %285 = arith.subf %284, %266 : vector<2x64xf32>
    %cst_134 = arith.constant 0.166666672 : f32
    %286 = vector.broadcast %cst_134 : f32 to vector<2x64xf32>
    %287 = arith.mulf %285, %286 : vector<2x64xf32>
    %288 = arith.addf %266, %287 : vector<2x64xf32>
    %289 = arith.mulf %283, %266 : vector<2x64xf32>
    %290 = arith.mulf %289, %228 : vector<2x64xf32>
    %291 = arith.subf %288, %290 : vector<2x64xf32>
    %cst_135 = arith.constant 0.000000e+00 : f32
    %cst_136 = arith.constant 1.000000e+00 : f32
    %292 = vector.broadcast %cst_135 : f32 to vector<2x64xf32>
    %293 = arith.maximumf %292, %291 : vector<2x64xf32>
    %294 = vector.broadcast %cst_136 : f32 to vector<2x64xf32>
    %295 = arith.minimumf %294, %293 : vector<2x64xf32>
    %296 = arith.mulf %295, %272 : vector<2x64xf32>
    %c0_137 = arith.constant 0 : index
    %c7_138 = arith.constant 7 : index
    %c0_139 = arith.constant 0 : index
    %297 = vector.load %arg8[%c0_137, %c7_138, %c0_139] : memref<2x8x64xf32, #tpu.memory_space<vmem>>, vector<2x1x64xf32>
    %298 = vector.shape_cast %297 : vector<2x1x64xf32> to vector<2x64xf32>
    %299 = vector.shape_cast %296 : vector<2x64xf32> to vector<2x1x64xf32>
    tpu.vector_store %arg8[%c0_137, %c7_138, %c0_139], %299 {strides = array<i32>} : memref<2x8x64xf32, #tpu.memory_space<vmem>>, vector<2x1x64xf32>,
    %c0_140 = arith.constant 0 : index
    %c0_141 = arith.constant 0 : index
    %c0_142 = arith.constant 0 : index
    %300 = vector.load %arg8[%c0_140, %c0_141, %c0_142] : memref<2x8x64xf32, #tpu.memory_space<vmem>>, vector<2x8x64xf32>
    %301 = vector.shape_cast %300 : vector<2x8x64xf32> to vector<16x64xf32>
    %c0_143 = arith.constant 0 : index
    %c0_144 = arith.constant 0 : index
    %302 = vector.load %arg2[%c0_143, %c0_144] : memref<64x16xf32, #tpu.memory_space<vmem>>, vector<64x16xf32>
    %cst_145 = arith.constant dense<0.000000e+00> : vector<16x16xf32>
    %303 = tpu.matmul %301, %302, %cst_145 {dimension_numbers = #tpu.dot_dimension_numbers<[1], [0], [0], [1], [0, 0, 1, 1], [], []>} : vector<16x64xf32>, vector<64x16xf32>, vector<16x16xf32> -> vector<16x16xf32>
    %c0_146 = arith.constant 0 : index
    %c0_147 = arith.constant 0 : index
    %304 = vector.load %arg3[%c0_146, %c0_147] : memref<1x16xf32, #tpu.memory_space<vmem>>, vector<1x16xf32>
    %305 = vector.broadcast %304 : vector<1x16xf32> to vector<16x16xf32>
    %306 = arith.addf %303, %305 : vector<16x16xf32>
    %cst_148 = arith.constant 0.000000e+00 : f32
    %307 = vector.broadcast %cst_148 : f32 to vector<16x16xf32>
    %308 = arith.maximumf %306, %307 : vector<16x16xf32>
    %c0_149 = arith.constant 0 : index
    %c0_150 = arith.constant 0 : index
    %309 = vector.load %arg7[%c0_149, %c0_150] : memref<16x16xf32, #tpu.memory_space<vmem>>, vector<16x16xf32>
    tpu.vector_store %arg7[%c0_149, %c0_150], %308 {strides = array<i32>} : memref<16x16xf32, #tpu.memory_space<vmem>>, vector<16x16xf32>,
    %310 = vector.shape_cast %308 : vector<16x16xf32> to vector<2x8x16xf32>
    %c0_151 = arith.constant 0 : index
    %c0_152 = arith.constant 0 : index
    %311 = vector.load %arg4[%c0_151, %c0_152] : memref<1x16xf32, #tpu.memory_space<vmem>>, vector<1x16xf32>
    %312 = vector.shape_cast %311 : vector<1x16xf32> to vector<1x1x16xf32>
    %313 = vector.broadcast %312 : vector<1x1x16xf32> to vector<2x8x16xf32>
    %314 = arith.mulf %310, %313 : vector<2x8x16xf32>
    %cst_153 = arith.constant dense<0.000000e+00> : vector<2x8xf32>
    %315 = vector.multi_reduction <add>, %314, %cst_153 [2] : vector<2x8x16xf32> to vector<2x8xf32>
    %c0_154 = arith.constant 0 : index
    %c0_155 = arith.constant 0 : index
    %316 = vector.load %arg5[%c0_154, %c0_155] : memref<1x1xf32, #tpu.memory_space<vmem>>, vector<1x1xf32>
    %317 = vector.broadcast %316 : vector<1x1xf32> to vector<2x8xf32>
    %318 = arith.addf %315, %317 : vector<2x8xf32>
    %c0_156 = arith.constant 0 : index
    %c0_157 = arith.constant 0 : index
    %319 = vector.load %arg6[%c0_156, %c0_157] : memref<2x8xf32, #tpu.memory_space<vmem>>, vector<2x8xf32>
    tpu.vector_store %arg6[%c0_156, %c0_157], %318 {strides = array<i32>} : memref<2x8xf32, #tpu.memory_space<vmem>>, vector<2x8xf32>,
    return
  }
  func.func @transform_0(%arg0: i32) -> (i32, i32, i32) {
    %c0_i32 = arith.constant 0 : i32
    %c0_i32_0 = arith.constant 0 : i32
    %c0_i32_1 = arith.constant 0 : i32
    return %arg0, %c0_i32, %c0_i32_0 : i32, i32, i32
  }
  func.func @transform_1(%arg0: i32) -> (i32, i32) {
    %c0_i32 = arith.constant 0 : i32
    %c0_i32_0 = arith.constant 0 : i32
    %c0_i32_1 = arith.constant 0 : i32
    return %c0_i32, %c0_i32_0 : i32, i32
  }
  func.func @transform_2(%arg0: i32) -> (i32, i32) {
    %c0_i32 = arith.constant 0 : i32
    %c0_i32_0 = arith.constant 0 : i32
    %c0_i32_1 = arith.constant 0 : i32
    return %c0_i32, %c0_i32_0 : i32, i32
  }
  func.func @transform_3(%arg0: i32) -> (i32, i32) {
    %c0_i32 = arith.constant 0 : i32
    %c0_i32_0 = arith.constant 0 : i32
    %c0_i32_1 = arith.constant 0 : i32
    return %c0_i32, %c0_i32_0 : i32, i32
  }
  func.func @transform_4(%arg0: i32) -> (i32, i32) {
    %c0_i32 = arith.constant 0 : i32
    %c0_i32_0 = arith.constant 0 : i32
    %c0_i32_1 = arith.constant 0 : i32
    return %c0_i32, %c0_i32_0 : i32, i32
  }
  func.func @transform_5(%arg0: i32) -> (i32, i32) {
    %c0_i32 = arith.constant 0 : i32
    %c0_i32_0 = arith.constant 0 : i32
    return %arg0, %c0_i32 : i32, i32
  }
  func.func @transform_6(%arg0: i32) -> (i32, i32) {
    %c0_i32 = arith.constant 0 : i32
    %c0_i32_0 = arith.constant 0 : i32
    return %arg0, %c0_i32 : i32, i32
  }
}

</mosaic_0001>

<bundles_post_ra>
// kernel: tpu_custom_call.1
= control target key start
LH: loop header
LB: loop body
LE: loop exit
PB: predicated region body
PF: predicated region fallthrough
CT: control target
= control target key end

     0   :  { %s982_s0 = inlined_call_operand.vmem [shape: f32[2,8,64], index: 0, kind: input, shape index: {}]   ;;  %s983_s1 = inlined_call_operand.vmem [shape: f32[64,16], index: 1, kind: input, shape index: {}]   ;;  %s984_s2 = inlined_call_operand.vmem [shape: f32[1,16], index: 2, kind: input, shape index: {}]   ;;  %s985_s3 = inlined_call_operand.vmem [shape: f32[1,16], index: 3, kind: input, shape index: {}]   ;;  %s986_s4 = inlined_call_operand.<no memory space> [shape: f32[1,1], index: 4, kind: input, shape index: {}]   ;;  %s987_s5 = inlined_call_operand.hbm [shape: f32[2,8], index: 5, kind: output, shape index: {0}]   ;;  %s988_s6 = inlined_call_operand.hbm [shape: f32[16,16], index: 6, kind: output, shape index: {1}]  }
   0x1   :  { %v12_v0 = vstv %s986_s4 }
   0x2   :  { %13 = vst [vmem:[#allocation3] sm:$0x1] %v12_v0 }
   0x3   :  { %14 = vsyncpa [#allocation5], 0  ;;  %v365_v1 = vld [vmem:[%s983_s1] sm:$0xff]  ;;  %v366_v2 = vld [vmem:[%s983_s1 + $0x8] sm:$0xff]  ;;  %vm28_vm0 = vcmask 516096  }
   0x4   :  { %v367_v3 = vld [vmem:[%s983_s1 + $0x10] sm:$0xff]  ;;  %v595_v4 = vpack.c.bf16 %v366_v2, %v365_v1  ;;  %v368_v5 = vld [vmem:[%s983_s1 + $0x18] sm:$0xff]  ;;  %v369_v7 = vld [vmem:[%s983_s1 + $0x20] sm:$0xff] }
   0x5   :  { %v599_v6 = vpack.c.bf16 %v368_v5, %v367_v3  ;;  %v370_v8 = vld [vmem:[%s983_s1 + $0x28] sm:$0xff]  ;;  %v26_v9 = vld [vmem:[%s982_s0] sm:$0x1]  ;;  %v371_v14 = vld [vmem:[%s983_s1 + $0x30] sm:$0xff] }
   0x6   :  { %596 = vmatprep.subr.bf16.mxu0 %v595_v4  ;;  %29 = vst.msk [vmem:[#allocation2] sm:$0x1] %vm28_vm0, %v26_v9  ;;  %v33_v10 = vmul.f32 0.5, %v26_v9  ;;  %v603_v11 = vpack.c.bf16 %v370_v8, %v369_v7  ;;  %v27_v13 = vld [vmem:[%s982_s0 + $0x8] sm:$0x1]  ;;  %v372_v15 = vld [vmem:[%s983_s1 + $0x38] sm:$0xff] }
   0x7   :  { %598 = vmatpush3.bf16.msra.mxu0 %v595_v4  ;;  %30 = vst.msk [vmem:[#allocation2 + $0x8] sm:$0x1] %vm28_vm0, %v27_v13  ;;  %v34_v16 = vmul.f32 0.5, %v27_v13 }
   0x8   :  { %600 = vmatprep.subr.bf16.mxu0 %v599_v6  ;;  %v35_v12 = vsub.f32 1.0, %v33_v10 }
   0x9   :  { %15 = vsyncpa [#allocation7], 0  ;;  %v36_v18 = vsub.f32 1.0, %v34_v16  ;;  %v607_v19 = vpack.c.bf16 %v372_v15, %v371_v14  ;;  %v31_v21 = vld [vmem:[%s982_s0 + $0x1] sm:$0x1]  ;;  %vm380_vm1 = vcmask 523264  }
   0xa   :  { %v37_v17 = vmax.f32 %v35_v12, 0.0  ;;  %v830_v31 = vld [vmem:[%s982_s0 + $0x9] sm:$0x1]  ;;  %v842_v46 = vld [vmem:[%s982_s0 + $0x2] sm:$0x1]  ;;  %vm464_vm2 = vcmask 130048  }
   0xb   :  { %602 = vmatpush3.bf16.msra.mxu0 %v599_v6  ;;  %v38_v22 = vmax.f32 %v36_v18, 0.0 }
   0xc   :  { %604 = vmatprep.subr.bf16.mxu0 %v603_v11  ;;  %v39_v20 = vmin.f32 %v37_v17, 1.0 }
   0xd   :  { %v824_v27 = vmin.f32 %v38_v22, 1.0 }
   0xe   :  { %v41_v23 = vmul.f32 %v39_v20, %v31_v21  ;;  %v541_v24 = vadd.f32 -0.5, %v39_v20  ;;  %v65_v25 = vsub.f32 1.0, %v39_v20  ;;  %v71_v26 = vmul.f32 0.49999422, %v39_v20 }
   0xf   :  { %606 = vmatpush3.bf16.msra.mxu0 %v603_v11  ;;  %v542_v32 = vadd.f32 -0.5, %v824_v27  ;;  %v66_v33 = vsub.f32 1.0, %v824_v27  ;;  %v72_v34 = vmul.f32 0.49999422, %v824_v27 }
  0x10   :  { %608 = vmatprep.subr.bf16.mxu0 %v607_v19  ;;  %43 = vst.msk [vmem:[#allocation2 + $0x1] sm:$0x1] %vm28_vm0, %v41_v23  ;;  %v49_v28 = vmul.f32 -20.0, %v541_v24  ;;  %v67_v29 = vmul.f32 0.16666667, %v65_v25  ;;  %v73_v30 = vmul.f32 %v71_v26, %v31_v21 }
  0x11   :  { %v50_v37 = vmul.f32 -20.0, %v542_v32  ;;  %v68_v38 = vmul.f32 0.16666667, %v66_v33  ;;  %v74_v39 = vmul.f32 %v72_v34, %v830_v31 }
  0x12   :  { %v51_v35 = vmul.f32 1.442695, %v49_v28  ;;  %v69_v36 = vadd.f32 %v67_v29, %v39_v20 }
  0x13   :  { %610 = vmatpush3.bf16.msra.mxu0 %v607_v19  ;;  %v53_v41 = vmul.f32 1.442695, %v50_v37  ;;  %v70_v42 = vadd.f32 %v68_v38, %v824_v27 }
  0x14   :  { %618 = vpow2.f32 %v51_v35  ;;  %v75_v40 = vsub.f32 %v69_v36, %v73_v30 }
  0x15   :  { %620 = vpow2.f32 %v53_v41  ;;  %v76_v44 = vsub.f32 %v70_v42, %v74_v39 }
  0x16   :  { %v77_v43 = vmax.f32 %v75_v40, 0.0 }
  0x17   :  { %v78_v47 = vmax.f32 %v76_v44, 0.0 }
  0x18   :  { %v837_v45 = vmin.f32 %v77_v43, 1.0 }
  0x19   :  { %v847_v50 = vmin.f32 %v78_v47, 1.0 }
  0x1a   :  { %v81_v48 = vmul.f32 %v837_v45, %v842_v46  ;;  %v543_v49 = vadd.f32 -0.5, %v837_v45  ;;  %v125_v34 = vsub.f32 1.0, %v837_v45 }
  0x1b   :  { %v544_v52 = vadd.f32 -0.5, %v847_v50  ;;  %v126_v38 = vsub.f32 1.0, %v847_v50 }
  0x1c   :  { %83 = vst.msk [vmem:[#allocation2 + $0x2] sm:$0x1] %vm28_vm0, %v81_v48  ;;  %v89_v51 = vmul.f32 -20.0, %v543_v49  ;;  %v127_v40 = vmul.f32 0.16666667, %v125_v34 }
  0x1d   :  { %v90_v56 = vmul.f32 -20.0, %v544_v52  ;;  %v128_v48 = vmul.f32 0.16666667, %v126_v38 }
  0x1e   :  { %v619_v53 = vpop.eup %618  ;;  %v91_v54 = vmul.f32 1.442695, %v89_v51  ;;  %v129_v49 = vadd.f32 %v127_v40, %v837_v45 }
  0x1f   :  { %v55_v55 = vadd.f32 1.0, %v619_v53  ;;  %v621_v57 = vpop.eup %620  ;;  %v93_v58 = vmul.f32 1.442695, %v90_v56 }
  0x20   :  { %622 = vpow2.f32 %v91_v54  ;;  %v56_v59 = vadd.f32 1.0, %v621_v57  ;;  %v865_v54 = vld [vmem:[%s982_s0 + $0xa] sm:$0x1] }
  0x21   :  { %624 = vrcp.f32 %v55_v55  ;;  %v130_v55 = vadd.f32 %v128_v48, %v847_v50 }
  0x22   :  { %626 = vpow2.f32 %v93_v58 }
  0x23   :  { %628 = vrcp.f32 %v56_v59 }
  0x2a   :  { %v623_v60 = vpop.eup %622 }
  0x2b   :  { %v625_v61 = vpop.eup %624  ;;  %v95_v62 = vadd.f32 1.0, %v623_v60 }
  0x2c   :  { %v61_v63 = vmul.f32 0.4375, %v625_v61  ;;  %v627_v0 = vpop.eup %626 }
  0x2d   :  { %630 = vrcp.f32 %v95_v62  ;;  %v629_v1 = vpop.eup %628  ;;  %v96_v3 = vadd.f32 1.0, %v627_v0 }
  0x2e   :  { %v63_v2 = vadd.f32 0.39196643, %v61_v63  ;;  %v62_v4 = vmul.f32 0.4375, %v629_v1 }
  0x2f   :  { %632 = vrcp.f32 %v96_v3 }
  0x30   :  { %v545_v5 = vadd.f32 -0.673, %v63_v2  ;;  %v64_v6 = vadd.f32 0.39196643, %v62_v4  ;;  %v117_v8 = vmul.f32 0.5555556, %v63_v2 }
  0x32   :  { %v103_v7 = vmul.f32 -50.0, %v545_v5  ;;  %v546_v9 = vadd.f32 -0.673, %v64_v6  ;;  %v118_v12 = vmul.f32 0.5555556, %v64_v6  ;;  %v119_v13 = vsub.f32 %v63_v2, %v117_v8 }
  0x34   :  { %v105_v10 = vmul.f32 1.442695, %v103_v7  ;;  %v104_v11 = vmul.f32 -50.0, %v546_v9  ;;  %v120_v17 = vsub.f32 %v64_v6, %v118_v12 }
  0x36   :  { %634 = vpow2.f32 %v105_v10  ;;  %v107_v15 = vmul.f32 1.442695, %v104_v11 }
  0x37   :  { %v631_v14 = vpop.eup %630 }
  0x38   :  { %v121_v16 = vmul.f32 0.4375, %v631_v14  ;;  %636 = vpow2.f32 %v107_v15 }
  0x39   :  { %v633_v18 = vpop.eup %632 }
  0x3a   :  { %v851_v19 = vadd.f32 %v121_v16, %v119_v13  ;;  %v122_v20 = vmul.f32 0.4375, %v633_v18  ;;  %v86_v16 = vld [vmem:[%s982_s0 + $0xb] sm:$0x1] }
  0x3c   :  { %v549_v21 = vadd.f32 -0.673, %v851_v19  ;;  %v854_v22 = vadd.f32 %v122_v20, %v120_v17 }
  0x3e   :  { %v163_v23 = vmul.f32 -50.0, %v549_v21  ;;  %v550_v24 = vadd.f32 -0.673, %v854_v22  ;;  %v178_v48 = vmul.f32 0.5555556, %v854_v22 }
  0x40   :  { %v635_v25 = vpop.eup %634  ;;  %v165_v26 = vmul.f32 1.442695, %v163_v23  ;;  %v164_v29 = vmul.f32 -50.0, %v550_v24 }
  0x41   :  { %v109_v28 = vadd.f32 1.0, %v635_v25 }
  0x42   :  { %638 = vpow2.f32 %v165_v26  ;;  %v637_v30 = vpop.eup %636  ;;  %v167_v32 = vmul.f32 1.442695, %v164_v29 }
  0x43   :  { %640 = vrcp.f32 %v109_v28  ;;  %v110_v33 = vadd.f32 1.0, %v637_v30  ;;  %v882_v30 = vld [vmem:[%s982_s0 + $0x4] sm:$0x1] }
  0x44   :  { %642 = vpow2.f32 %v167_v32 }
  0x45   :  { %644 = vrcp.f32 %v110_v33 }
  0x4c   :  { %v639_v35 = vpop.eup %638 }
  0x4d   :  { %v641_v36 = vpop.eup %640  ;;  %v169_v37 = vadd.f32 1.0, %v639_v35 }
  0x4e   :  { %v112_v39 = vmul.f32 0.2, %v641_v36  ;;  %v643_v41 = vpop.eup %642 }
  0x4f   :  { %646 = vrcp.f32 %v169_v37  ;;  %v645_v42 = vpop.eup %644  ;;  %v170_v44 = vadd.f32 1.0, %v643_v41 }
  0x50   :  { %v115_v43 = vadd.f32 0.3, %v112_v39  ;;  %v114_v47 = vmul.f32 0.2, %v645_v42 }
  0x51   :  { %648 = vrcp.f32 %v170_v44 }
  0x52   :  { %v131_v51 = vmul.f32 %v115_v43, %v837_v45  ;;  %v116_v52 = vadd.f32 0.3, %v114_v47  ;;  %v177_v47 = vmul.f32 0.5555556, %v851_v19 }
  0x54   :  { %v133_v53 = vmul.f32 %v131_v51, %v842_v46  ;;  %v132_v56 = vmul.f32 %v116_v52, %v847_v50  ;;  %v85_v46 = vld [vmem:[%s982_s0 + $0x3] sm:$0x1]  ;;  %v179_v51 = vsub.f32 %v851_v19, %v177_v47 }
  0x56   :  { %v135_v57 = vsub.f32 %v129_v49, %v133_v53  ;;  %v134_v58 = vmul.f32 %v132_v56, %v865_v54  ;;  %v180_v56 = vsub.f32 %v854_v22, %v178_v48 }
  0x58   :  { %v137_v59 = vmax.f32 %v135_v57, 0.0  ;;  %v136_v61 = vsub.f32 %v130_v55, %v134_v58  ;;  %v42_v58 = vmul.f32 %v824_v27, %v830_v31 }
  0x59   :  { %v647_v60 = vpop.eup %646 }
  0x5a   :  { %v139_v45 = vmin.f32 %v137_v59, 1.0  ;;  %v172_v62 = vmul.f32 0.2, %v647_v60  ;;  %v138_v63 = vmax.f32 %v136_v61, 0.0  ;;  %v82_v59 = vmul.f32 %v847_v50, %v865_v54  ;;  %v902_v61 = vld [vmem:[%s982_s0 + $0xc] sm:$0x1] }
  0x5b   :  { %v649_v0 = vpop.eup %648  ;;  %44 = vst.msk [vmem:[#allocation2 + $0x9] sm:$0x1] %vm28_vm0, %v42_v58 }
  0x5c   :  { %v141_v1 = vmul.f32 %v139_v45, %v85_v46  ;;  %v547_v2 = vadd.f32 -0.5, %v139_v45  ;;  %v175_v3 = vadd.f32 0.3, %v172_v62  ;;  %v185_v4 = vsub.f32 1.0, %v139_v45  ;;  %84 = vst.msk [vmem:[#allocation2 + $0xa] sm:$0x1] %vm28_vm0, %v82_v59 }
  0x5d   :  { %v140_v5 = vmin.f32 %v138_v63, 1.0  ;;  %v174_v6 = vmul.f32 0.2, %v649_v0 }
  0x5e   :  { %143 = vst.msk [vmem:[#allocation2 + $0x3] sm:$0x1] %vm28_vm0, %v141_v1  ;;  %v149_v7 = vmul.f32 -20.0, %v547_v2  ;;  %v187_v8 = vmul.f32 0.16666667, %v185_v4  ;;  %v191_v9 = vmul.f32 %v175_v3, %v139_v45 }
  0x5f   :  { %v548_v10 = vadd.f32 -0.5, %v140_v5  ;;  %v176_v11 = vadd.f32 0.3, %v174_v6  ;;  %v186_v12 = vsub.f32 1.0, %v140_v5  ;;  %v142_v60 = vmul.f32 %v140_v5, %v86_v16 }
  0x60   :  { %v151_v13 = vmul.f32 1.442695, %v149_v7  ;;  %v189_v14 = vadd.f32 %v187_v8, %v139_v45  ;;  %v193_v15 = vmul.f32 %v191_v9, %v85_v46 }
  0x61   :  { %v150_v17 = vmul.f32 -20.0, %v548_v10  ;;  %v188_v18 = vmul.f32 0.16666667, %v186_v12  ;;  %v192_v20 = vmul.f32 %v176_v11, %v140_v5  ;;  %144 = vst.msk [vmem:[#allocation2 + $0xb] sm:$0x1] %vm28_vm0, %v142_v60 }
  0x62   :  { %650 = vpow2.f32 %v151_v13  ;;  %v195_v21 = vsub.f32 %v189_v14, %v193_v15 }
  0x63   :  { %v153_v23 = vmul.f32 1.442695, %v150_v17  ;;  %v190_v24 = vadd.f32 %v188_v18, %v140_v5  ;;  %v194_v25 = vmul.f32 %v192_v20, %v86_v16 }
  0x64   :  { %v197_v26 = vmax.f32 %v195_v21, 0.0 }
  0x65   :  { %652 = vpow2.f32 %v153_v23  ;;  %v196_v28 = vsub.f32 %v190_v24, %v194_v25 }
  0x66   :  { %v877_v29 = vmin.f32 %v197_v26, 1.0 }
  0x67   :  { %v198_v32 = vmax.f32 %v196_v28, 0.0 }
  0x68   :  { %v201_v33 = vmul.f32 %v877_v29, %v882_v30  ;;  %v551_v34 = vadd.f32 -0.5, %v877_v29  ;;  %v245_v24 = vsub.f32 1.0, %v877_v29 }
  0x69   :  { %v887_v35 = vmin.f32 %v198_v32, 1.0 }
  0x6a   :  { %203 = vst.msk [vmem:[#allocation2 + $0x4] sm:$0x1] %vm28_vm0, %v201_v33  ;;  %v209_v36 = vmul.f32 -20.0, %v551_v34  ;;  %v247_v34 = vmul.f32 0.16666667, %v245_v24 }
  0x6b   :  { %v552_v37 = vadd.f32 -0.5, %v887_v35  ;;  %v202_v62 = vmul.f32 %v887_v35, %v902_v61  ;;  %v246_v32 = vsub.f32 1.0, %v887_v35 }
  0x6c   :  { %v651_v38 = vpop.eup %650  ;;  %v211_v39 = vmul.f32 1.442695, %v209_v36 }
  0x6d   :  { %v155_v40 = vadd.f32 1.0, %v651_v38  ;;  %v210_v41 = vmul.f32 -20.0, %v552_v37  ;;  %204 = vst.msk [vmem:[#allocation2 + $0xc] sm:$0x1] %vm28_vm0, %v202_v62 }
  0x6e   :  { %654 = vpow2.f32 %v211_v39 }
  0x6f   :  { %v653_v42 = vpop.eup %652  ;;  %656 = vrcp.f32 %v155_v40  ;;  %v213_v43 = vmul.f32 1.442695, %v210_v41  ;;  %v248_v41 = vmul.f32 0.16666667, %v246_v32 }
  0x70   :  { %v156_v44 = vadd.f32 1.0, %v653_v42  ;;  %v249_v42 = vadd.f32 %v247_v34, %v877_v29 }
  0x71   :  { %658 = vpow2.f32 %v213_v43  ;;  %v250_v48 = vadd.f32 %v248_v41, %v887_v35 }
  0x72   :  { %660 = vrcp.f32 %v156_v44 }
  0x78   :  { %v655_v49 = vpop.eup %654 }
  0x79   :  { %v657_v52 = vpop.eup %656  ;;  %v215_v53 = vadd.f32 1.0, %v655_v49 }
  0x7a   :  { %v181_v55 = vmul.f32 0.4375, %v657_v52 }
  0x7b   :  { %v659_v57 = vpop.eup %658  ;;  %662 = vrcp.f32 %v215_v53 }
  0x7c   :  { %v661_v19 = vpop.eup %660  ;;  %v183_v45 = vadd.f32 %v181_v55, %v179_v51  ;;  %v216_v22 = vadd.f32 1.0, %v659_v57 }
  0x7d   :  { %v182_v27 = vmul.f32 0.4375, %v661_v19 }
  0x7e   :  { %v553_v31 = vadd.f32 -0.673, %v183_v45  ;;  %664 = vrcp.f32 %v216_v22  ;;  %v237_v46 = vmul.f32 0.5555556, %v183_v45 }
  0x7f   :  { %v184_v50 = vadd.f32 %v182_v27, %v180_v56 }
  0x80   :  { %v223_v54 = vmul.f32 -50.0, %v553_v31  ;;  %v239_v3 = vsub.f32 %v183_v45, %v237_v46 }
  0x81   :  { %v554_v63 = vadd.f32 -0.673, %v184_v50  ;;  %v238_v2 = vmul.f32 0.5555556, %v184_v50 }
  0x82   :  { %v225_v0 = vmul.f32 1.442695, %v223_v54 }
  0x83   :  { %v224_v1 = vmul.f32 -50.0, %v554_v63  ;;  %v240_v7 = vsub.f32 %v184_v50, %v238_v2  ;;  %v206_v50 = vld [vmem:[%s982_s0 + $0xd] sm:$0x1] }
  0x84   :  { %666 = vpow2.f32 %v225_v0 }
  0x85   :  { %v663_v4 = vpop.eup %662  ;;  %v227_v5 = vmul.f32 1.442695, %v224_v1 }
  0x86   :  { %v241_v6 = vmul.f32 0.4375, %v663_v4 }
  0x87   :  { %668 = vpow2.f32 %v227_v5 }
  0x88   :  { %v665_v8 = vpop.eup %664  ;;  %v910_v9 = vadd.f32 %v241_v6, %v239_v3 }
  0x89   :  { %v242_v10 = vmul.f32 0.4375, %v665_v8 }
  0x8a   :  { %v557_v11 = vadd.f32 -0.673, %v910_v9  ;;  %v297_v32 = vmul.f32 0.5555556, %v910_v9 }
  0x8b   :  { %v913_v12 = vadd.f32 %v242_v10, %v240_v7 }
  0x8c   :  { %v283_v13 = vmul.f32 -50.0, %v557_v11  ;;  %v299_v34 = vsub.f32 %v910_v9, %v297_v32 }
  0x8d   :  { %v558_v14 = vadd.f32 -0.673, %v913_v12 }
  0x8e   :  { %v667_v15 = vpop.eup %666  ;;  %v285_v16 = vmul.f32 1.442695, %v283_v13 }
  0x8f   :  { %v229_v17 = vadd.f32 1.0, %v667_v15  ;;  %v284_v18 = vmul.f32 -50.0, %v558_v14 }
  0x90   :  { %670 = vpow2.f32 %v285_v16  ;;  %v265_v16 = vld [vmem:[%s982_s0 + $0x6] sm:$0x1] }
  0x91   :  { %v669_v20 = vpop.eup %668  ;;  %672 = vrcp.f32 %v229_v17  ;;  %v287_v21 = vmul.f32 1.442695, %v284_v18 }
  0x92   :  { %v230_v23 = vadd.f32 1.0, %v669_v20 }
  0x93   :  { %674 = vpow2.f32 %v287_v21  ;;  %v266_v21 = vld [vmem:[%s982_s0 + $0xe] sm:$0x1] }
  0x94   :  { %676 = vrcp.f32 %v230_v23 }
  0x9a   :  { %v671_v25 = vpop.eup %670 }
  0x9b   :  { %v673_v26 = vpop.eup %672  ;;  %v289_v28 = vadd.f32 1.0, %v671_v25 }
  0x9c   :  { %v232_v33 = vmul.f32 0.2, %v673_v26 }
  0x9d   :  { %v675_v36 = vpop.eup %674  ;;  %678 = vrcp.f32 %v289_v28 }
  0x9e   :  { %v677_v37 = vpop.eup %676  ;;  %v235_v38 = vadd.f32 0.3, %v232_v33  ;;  %v290_v39 = vadd.f32 1.0, %v675_v36  ;;  %v298_v33 = vmul.f32 0.5555556, %v913_v12 }
  0x9f   :  { %v234_v40 = vmul.f32 0.2, %v677_v37 }
  0xa0   :  { %v251_v43 = vmul.f32 %v235_v38, %v877_v29  ;;  %680 = vrcp.f32 %v290_v39  ;;  %v205_v29 = vld [vmem:[%s982_s0 + $0x5] sm:$0x1]  ;;  %v300_v38 = vsub.f32 %v913_v12, %v298_v33 }
  0xa1   :  { %v236_v44 = vadd.f32 0.3, %v234_v40 }
  0xa2   :  { %v253_v47 = vmul.f32 %v251_v43, %v882_v30 }
  0xa3   :  { %v252_v49 = vmul.f32 %v236_v44, %v887_v35 }
  0xa4   :  { %v255_v51 = vsub.f32 %v249_v42, %v253_v47 }
  0xa5   :  { %v254_v52 = vmul.f32 %v252_v49, %v902_v61 }
  0xa6   :  { %v257_v53 = vmax.f32 %v255_v51, 0.0 }
  0xa7   :  { %v679_v55 = vpop.eup %678  ;;  %v256_v56 = vsub.f32 %v250_v48, %v254_v52 }
  0xa8   :  { %v259_v57 = vmin.f32 %v257_v53, 1.0  ;;  %v292_v58 = vmul.f32 0.2, %v679_v55 }
  0xa9   :  { %v258_v59 = vmax.f32 %v256_v56, 0.0 }
  0xaa   :  { %v681_v60 = vpop.eup %680  ;;  %v261_v19 = vmul.f32 %v259_v57, %v205_v29  ;;  %v555_v30 = vadd.f32 -0.5, %v259_v57  ;;  %v295_v45 = vadd.f32 0.3, %v292_v58  ;;  %v305_v62 = vsub.f32 1.0, %v259_v57 }
  0xab   :  { %v260_v22 = vmin.f32 %v258_v59, 1.0  ;;  %v294_v35 = vmul.f32 0.2, %v681_v60 }
  0xac   :  { %263 = vst.msk [vmem:[#allocation2 + $0x5] sm:$0x1] %vm28_vm0, %v261_v19  ;;  %v269_v61 = vmul.f32 -20.0, %v555_v30  ;;  %v307_v27 = vmul.f32 0.16666667, %v305_v62  ;;  %v311_v31 = vmul.f32 %v295_v45, %v259_v57 }
  0xad   :  { %v262_v54 = vmul.f32 %v260_v22, %v206_v50  ;;  %v556_v46 = vadd.f32 -0.5, %v260_v22  ;;  %v296_v63 = vadd.f32 0.3, %v294_v35  ;;  %v306_v0 = vsub.f32 1.0, %v260_v22 }
  0xae   :  { %v271_v1 = vmul.f32 1.442695, %v269_v61  ;;  %v309_v2 = vadd.f32 %v307_v27, %v259_v57  ;;  %v313_v3 = vmul.f32 %v311_v31, %v205_v29 }
  0xaf   :  { %264 = vst.msk [vmem:[#allocation2 + $0xd] sm:$0x1] %vm28_vm0, %v262_v54  ;;  %v270_v4 = vmul.f32 -20.0, %v556_v46  ;;  %v308_v5 = vmul.f32 0.16666667, %v306_v0  ;;  %v312_v6 = vmul.f32 %v296_v63, %v260_v22 }
  0xb0   :  { %682 = vpow2.f32 %v271_v1  ;;  %v315_v7 = vsub.f32 %v309_v2, %v313_v3  ;;  %v325_v46 = vld [vmem:[%s982_s0 + $0x7] sm:$0x1]  ;;  %v326_v3 = vld [vmem:[%s982_s0 + $0xf] sm:$0x1] }
  0xb1   :  { %v273_v8 = vmul.f32 1.442695, %v270_v4  ;;  %v310_v10 = vadd.f32 %v308_v5, %v260_v22  ;;  %v314_v11 = vmul.f32 %v312_v6, %v206_v50 }
  0xb2   :  { %v317_v13 = vmax.f32 %v315_v7, 0.0 }
  0xb3   :  { %684 = vpow2.f32 %v273_v8  ;;  %v316_v14 = vsub.f32 %v310_v10, %v314_v11  ;;  %v565_v8 = vld [vmem:[#allocation3] ss:$0 sm:$0xff]  ;;  %v746_v10 = vmov 0   ;;  %v561_v11 = vld [vmem:[%s984_s2] ss:$0 sm:$0xff]  ;;  %s747_s2 = smov [#allocation6]  }
  0xb4   :  { %v319_v15 = vmin.f32 %v317_v13, 1.0  ;;  %616 = vset.pattern.permute.xlu1 %v746_v10  ;;  %617 = vset.pattern.permute.xlu0 %v746_v10  ;;  %s526_s22 = sshll.u32 %s747_s2, 4  ;;  %s527_s22 = int_to_ptr.vmem [resolvable:$true] %s526_s22 }
  0xb5   :  { %v318_v17 = vmax.f32 %v316_v14, 0.0  ;;  %489 = vperm.xlu1 %616, %v565_v8   ;;  %s698_s23 = scalar_lea.vmem %s527_s22, 256  ;;  %p703_p1 = scmp.lt.s32.totalorder %s527_s22, %s527_s22 }
  0xb6   :  { %v321_v18 = vmul.f32 %v319_v15, %v265_v16  ;;  %v343_v56 = vsub.f32 1.0, %v319_v15  ;;  %p699_p0 = scmp.ne.s32.totalorder %s527_s22, %s698_s23  ;;  %p704_p2 = scmp.lt.s32.totalorder %s698_s23, %s698_s23 }
  0xb7   :  { %v320_v20 = vmin.f32 %v318_v17, 1.0 }
  0xb8   :  { %323 = vst.msk [vmem:[#allocation2 + $0x6] sm:$0x1] %vm28_vm0, %v321_v18  ;;  %v345_v29 = vmul.f32 0.16666667, %v343_v56  ;;  %v564_v18 = vld [vmem:[%s985_s3] ss:$0 sm:$0xff]  ;;  %p705_p3 = por %p704_p2, %p703_p1 }
  0xb9   :  { %v322_v23 = vmul.f32 %v320_v20, %v266_v21  ;;  %v344_v57 = vsub.f32 1.0, %v320_v20 }
  0xba   :  { %v683_v24 = vpop.eup %682  ;;  %v347_v45 = vadd.f32 %v345_v29, %v319_v15  ;;  %p706_p4 = pnand %p705_p3, %p699_p0 }
  0xbb   :  { %v275_v25 = vadd.f32 1.0, %v683_v24  ;;  %324 = vst.msk [vmem:[#allocation2 + $0xe] sm:$0x1] %vm28_vm0, %v322_v23  ;;  %v346_v30 = vmul.f32 0.16666667, %v344_v57 }
  0xbd   :  { %v685_v26 = vpop.eup %684  ;;  %686 = vrcp.f32 %v275_v25  ;;  %v348_v61 = vadd.f32 %v346_v30, %v320_v20 }
  0xbe   :  { %v276_v28 = vadd.f32 1.0, %v685_v26 }
  0xc0   :  { %688 = vrcp.f32 %v276_v28 }
  0xc7   :  { %v687_v36 = vpop.eup %686 }
  0xc8   :  { %v301_v37 = vmul.f32 0.4375, %v687_v36 }
  0xca   :  { %v689_v39 = vpop.eup %688  ;;  %v303_v40 = vadd.f32 %v301_v37, %v299_v34 }
  0xcb   :  { %v302_v41 = vmul.f32 0.4375, %v689_v39 }
  0xcc   :  { %v559_v42 = vadd.f32 -0.673, %v303_v40 }
  0xcd   :  { %v304_v43 = vadd.f32 %v302_v41, %v300_v38 }
  0xce   :  { %v329_v44 = vmul.f32 -50.0, %v559_v42 }
  0xcf   :  { %v560_v47 = vadd.f32 -0.673, %v304_v43 }
  0xd0   :  { %v331_v48 = vmul.f32 1.442695, %v329_v44 }
  0xd1   :  { %v330_v49 = vmul.f32 -50.0, %v560_v47 }
  0xd2   :  { %690 = vpow2.f32 %v331_v48 }
  0xd3   :  { %v333_v51 = vmul.f32 1.442695, %v330_v49 }
  0xd5   :  { %692 = vpow2.f32 %v333_v51 }
  0xdc   :  { %v691_v52 = vpop.eup %690 }
  0xdd   :  { %v335_v53 = vadd.f32 1.0, %v691_v52 }
  0xdf   :  { %v693_v55 = vpop.eup %692  ;;  %694 = vrcp.f32 %v335_v53 }
  0xe0   :  { %v336_v9 = vadd.f32 1.0, %v693_v55 }
  0xe2   :  { %696 = vrcp.f32 %v336_v9 }
  0xe9   :  { %v695_v12 = vpop.eup %694 }
  0xea   :  { %v338_v58 = vmul.f32 0.2, %v695_v12 }
  0xec   :  { %v697_v59 = vpop.eup %696  ;;  %v341_v60 = vadd.f32 0.3, %v338_v58 }
  0xed   :  { %v340_v19 = vmul.f32 0.2, %v697_v59 }
  0xee   :  { %v349_v62 = vmul.f32 %v341_v60, %v319_v15 }
  0xef   :  { %v342_v22 = vadd.f32 0.3, %v340_v19 }
  0xf0   :  { %v351_v35 = vmul.f32 %v349_v62, %v265_v16 }
  0xf1   :  { %v350_v27 = vmul.f32 %v342_v22, %v320_v20 }
  0xf2   :  { %v353_v31 = vsub.f32 %v347_v45, %v351_v35 }
  0xf3   :  { %v352_v50 = vmul.f32 %v350_v27, %v266_v21 }
  0xf4   :  { %v355_v54 = vmax.f32 %v353_v31, 0.0 }
  0xf5   :  { %v354_v63 = vsub.f32 %v348_v61, %v352_v50 }
  0xf6   :  { %v357_v0 = vmin.f32 %v355_v54, 1.0 }
  0xf7   :  { %v356_v1 = vmax.f32 %v354_v63, 0.0 }
  0xf8   :  { %v359_v2 = vmul.f32 %v357_v0, %v325_v46 }
  0xf9   :  { %v358_v4 = vmin.f32 %v356_v1, 1.0 }
  0xfa   :  { %361 = vst.msk [vmem:[#allocation2 + $0x7] sm:$0x1] %vm28_vm0, %v359_v2 }
  0xfb   :  { %v360_v5 = vmul.f32 %v358_v4, %v326_v3 }
  0xfd   :  { %362 = vst.msk [vmem:[#allocation2 + $0xf] sm:$0x1] %vm28_vm0, %v360_v5 }
 0x101   :  { %v363_v6 = vld [vmem:[#allocation2] sm:$0xff] }
 0x102   :  { %592 = vmatprep.mubr.msk.f32.mxu0 %vm380_vm1, %v363_v6 }
 0x104   :  { %v364_v7 = vld [vmem:[#allocation2 + $0x8] sm:$0xff] }
 0x105   :  { %593 = vmatmul.mubr.msk.f32.vlgmr.msra.gmra.mrb[0].mxu0 %vm380_vm1, %v364_v7 }
 0x1d8   :  { %v594_v13 = vpop.f32.mrb[0].mxu0 }
 0x1d9   :  { %v459_v14 = vadd.f32 %v594_v13, %v561_v11  ;;  %v453_v15 = vpop.f32.mrb[1].mxu0 }
 0x1da   :  { %v454_v16 = vadd.f32 %v561_v11, %v453_v15 }
 0x1db   :  { %v463_v17 = vmax.f32 %v459_v14, 0.0 }
 0x1dc   :  { %v462_v20 = vmax.f32 %v454_v16, 0.0 }
 0x1dd   :  { %466 = vst.msk [vmem:[#allocation6 + $0x8] sm:$0xff] %vm464_vm2, %v463_v17  ;;  %v475_v24 = vmul.f32 %v564_v18, %v463_v17 }
 0x1de   :  { %465 = vst.msk [vmem:[#allocation6] sm:$0xff] %vm464_vm2, %v462_v20  ;;  %v474_v21 = vmul.f32 %v564_v18, %v462_v20 }
 0x1df   :  { %v479_v25 = vsel %vm464_vm2, %v475_v24, 0.0 }
 0x1e0   :  { %v476_v23 = vsel %vm464_vm2, %v474_v21, 0.0 }
 0x1e1   :  { %477 = vadd.xlane.f32.xlu0 %v476_v23 }
 0x1e5   :  { %480 = vadd.xlane.f32.xlu0 %v479_v25 }
 0x1e6   :  { %709 = shalt.err (!%p706_p4)
}
 0x1e7   :  { %s710_s25 = scalar_lea.hbm %s988_s6, 256 }
 0x1e8   :  { %p711_p5 = scmp.ne.s32.totalorder %s988_s6, %s710_s25  ;;  %p714_p6 = scmp.lt.u32.totalorder %s710_s25, %s988_s6 }
 0x1ea   :  { %p716_p7 = pnand %p714_p6, %p711_p5 }
 0x1ec   :  { %719 = shalt.err (!%p716_p7)
}
 0x1ed   :  { %s748_s30 = smov 128   ;;  %s749_s4 = smov 8   ;;  %v496_v26 = vlaneseq  ;;  %v490_v33 = vpop.permute.xlu1 %489  ;;  %vm506_vm3 = vcmask 1041409   ;;  %vm509_vm4 = vcmask 58368  }
 0x1ee   :  { %532 = dma.vmem_to_hbm [thread:$0]  %s527_s22, 256, %s988_s6, [#allocation7], %s748_s30, %s748_s30, %s749_s4  }
 0x1ef   :  { %v497_v28 = vand.u32 127, %v496_v26  ;;  %v499_v32 = vshrl.u32 %v496_v26, 7  ;;  %s750_s9 = smov [#allocation4]  }
 0x1f0   :  { %s517_s10 = sshll.u32 %s750_s9, 4  ;;  %s518_s10 = int_to_ptr.vmem [resolvable:$true] %s517_s10 }
 0x1f1   :  { %v500_v36 = vsub.s32 %v497_v28, %v499_v32  ;;  %s720_s11 = scalar_lea.vmem %s518_s10, 32  ;;  %p725_p9 = scmp.lt.s32.totalorder %s518_s10, %s518_s10 }
 0x1f2   :  { %p721_p8 = scmp.ne.s32.totalorder %s518_s10, %s720_s11  ;;  %p726_p10 = scmp.lt.s32.totalorder %s720_s11, %s720_s11 }
 0x1f4   :  { %p727_p11 = por %p726_p10, %p725_p9 }
 0x1f6   :  { %p728_p12 = pnand %p727_p11, %p721_p8 }
 0x26e   :  { %v478_v34 = vpop.xlane.xlu0 %477 }
 0x26f   :  { %v492_v37 = vadd.f32 %v490_v33, %v478_v34 }
 0x271   :  { %v501_v40 = vrot.slane %v492_v37, %v500_v36 }
 0x272   :  { %v481_v38 = vpop.xlane.xlu0 %480 }
 0x273   :  { %v493_v39 = vadd.f32 %v490_v33, %v481_v38 }
 0x275   :  { %v505_v41 = vrot.slane %v493_v39, %v500_v36 }
 0x277   :  { %v507_v42 = vsel %vm506_vm3, %v505_v41, %v501_v40 }
 0x278   :  { %510 = vst.msk [vmem:[#allocation4] sm:$0x3] %vm509_vm4, %v507_v42 }
 0x279   :  { %731 = shalt.err (!%p728_p12)
}
 0x27a   :  { %s732_s13 = scalar_lea.hbm %s987_s5, 32 }
 0x27b   :  { %p733_p13 = scmp.ne.s32.totalorder %s987_s5, %s732_s13  ;;  %p736_p0 = scmp.lt.u32.totalorder %s732_s13, %s987_s5 }
 0x27d   :  { %p738_p1 = pnand %p736_p0, %p733_p13 }
 0x27f   :  { %741 = shalt.err (!%p738_p1)
}
 0x280   :  { %520 = dma.vmem_to_hbm [thread:$0]  %s518_s10, 32, %s987_s5, [#allocation5]  }
 0x281   :  { %742 = dma.done.wait [#allocation5], 32  }
 0x282   :  { %743 = vsyncadd [#allocation5], 4294967264 }
 0x283   :  { %744 = dma.done.wait [#allocation7], 256  }
 0x284   :  { %745 = vsyncadd [#allocation7], 4294967040 }
 0x285   :  { %539 = vsyncpa [#allocation5], 1 }
 0x286   :  { %540 = vsyncpa [#allocation7], 1 }

</bundles_post_ra>
